<compile_context>
chip_gen: v7x
topology: tpu7x:2x2x1
jax: 0.10.0
libtpu: 0.0.40
codegen_flags: <defaults>
</compile_context>

<pallas_src>
import functools

import jax
import jax.numpy as jnp
from jax.experimental import pallas as pl
from jax.experimental.pallas import tpu as pltpu


def mlp_kernel(x_ref, w1_ref, b1_ref, w2_ref, b2_ref, o_ref):
    # Layer 1: bf16 MXU matmul (in-kernel cast of the x tile), f32 accumulate;
    # bias + ReLU on the VPU.
    x = x_ref[...].astype(jnp.bfloat16)                         # (TILE_B, D)
    h = jnp.dot(x, w1_ref[...], preferred_element_type=jnp.float32)
    h = jnp.maximum(h + b1_ref[...], 0.0)                       # (TILE_B, H) f32
    # Layer 2 (out_features == 1): VPU multiply + last-axis (lane) reduce; the
    # scalar bias comes from SMEM.
    out = jnp.sum(h * w2_ref[...], axis=-1) + b2_ref[0, 0]      # (TILE_B,)
    # Lane-dense store: one (1, TILE_B) row per grid step.
    o_ref[...] = out.reshape(1, -1).astype(o_ref.dtype)


def _round_up(n, m):
    return ((n + m - 1) // m) * m


@functools.partial(jax.jit, static_argnames=("tile_b",))
def neural_network_forward(x, w1, b1, w2, b2, *, tile_b=1024):
    """x: (B, D) f32; w1: (D, H); b1: (1, H) or (H,); w2: (H, 1); b2: (1, 1) or (1,)."""
    B, D = x.shape
    H = w1.shape[1]

    # Shrink the tile for small batches (avoids over-fetch); keep it a
    # multiple of 8 (sublane) when the grid has more than one step.
    tile_b_eff = min(tile_b, _round_up(B, 8))
    num_tiles = pl.cdiv(B, tile_b_eff)

    w1_bf = w1.astype(jnp.bfloat16)                   # tiny, resident in VMEM
    b1_row = b1.reshape(1, H).astype(jnp.float32)
    w2_row = w2.reshape(1, H).astype(jnp.float32)     # (1, H) row for VPU path
    b2_s = b2.reshape(1, 1).astype(jnp.float32)       # scalar -> SMEM

    out = pl.pallas_call(
        mlp_kernel,
        out_shape=jax.ShapeDtypeStruct((num_tiles, tile_b_eff), jnp.float32),
        grid=(num_tiles,),
        in_specs=[
            pl.BlockSpec((tile_b_eff, D), lambda i: (i, 0)),       # x tile
            pl.BlockSpec((D, H), lambda i: (0, 0)),                # w1 resident
            pl.BlockSpec((1, H), lambda i: (0, 0)),                # b1 resident
            pl.BlockSpec((1, H), lambda i: (0, 0)),                # w2 row resident
            pl.BlockSpec(memory_space=pltpu.MemorySpace.SMEM),     # b2 scalar
        ],
        out_specs=pl.BlockSpec((1, tile_b_eff), lambda i: (i, 0)),  # lane-dense
        compiler_params=pltpu.CompilerParams(
            dimension_semantics=("parallel",),
        ),
    )(x, w1_bf, b1_row, w2_row, b2_s)

    # (num_tiles, tile_b_eff) -> (B, 1); edge-tile garbage rows (if the grid
    # over-covers the batch) are dropped here.
    return out.reshape(-1, 1)[:B]


def init_params(key, input_size, hidden=64, out=1):
    # Deterministic init mimicking PyTorch nn.Linear default:
    # U(-1/sqrt(fan_in), 1/sqrt(fan_in)) for both weight and bias.
    k1, k2, k3, k4 = jax.random.split(key, 4)
    bound1 = 1.0 / jnp.sqrt(jnp.float32(input_size))
    bound2 = 1.0 / jnp.sqrt(jnp.float32(hidden))
    w1 = jax.random.uniform(k1, (input_size, hidden), jnp.float32, -bound1, bound1)
    b1 = jax.random.uniform(k2, (1, hidden), jnp.float32, -bound1, bound1)
    w2 = jax.random.uniform(k3, (hidden, out), jnp.float32, -bound2, bound2)
    b2 = jax.random.uniform(k4, (1, out), jnp.float32, -bound2, bound2)
    return w1, b1, w2, b2


if __name__ == "__main__":
    key = jax.random.PRNGKey(0)
    k_x, k_p = jax.random.split(key)

    batch = 8
    input_size = 32

    x = jax.random.normal(k_x, (batch, input_size), dtype=jnp.float32)
    w1, b1, w2, b2 = init_params(k_p, input_size)

    logits = neural_network_forward(x, w1, b1, w2, b2)
    jax.block_until_ready(logits)

    # Reference check in plain JAX (same math as the PyTorch module).
    # Tolerance loosened slightly because layer 1 runs on the MXU in bf16.
    ref = jnp.maximum(x @ w1 + b1, 0.0) @ w2 + b2
    assert logits.shape == (batch, 1)
    assert jnp.allclose(logits, ref, atol=1e-2, rtol=1e-2), float(
        jnp.max(jnp.abs(logits - ref))
    )

    print("KERNEL_OK")
</pallas_src>

<mosaic_0001>
module attributes {stable_mosaic.version = 11 : i64} {
  func.func @mlp_kernel(%arg0: i32, %arg1: memref<8x32xf32, #tpu.memory_space<vmem>>, %arg2: memref<32x64xbf16, #tpu.memory_space<vmem>>, %arg3: memref<1x64xf32, #tpu.memory_space<vmem>>, %arg4: memref<1x64xf32, #tpu.memory_space<vmem>>, %arg5: memref<1x1xf32, #tpu.memory_space<smem>>, %arg6: memref<1x8xf32, #tpu.memory_space<vmem>>) attributes {dimension_semantics = [#tpu.dimension_semantics<parallel>], iteration_bounds = array<i64: 1>, scalar_prefetch = 0 : i64, scratch_operands = 0 : i64, tpu.core_type = #tpu.core_type<tc>, window_params = [{transform_indices = @transform_0, window_bounds = array<i64: 8, 32>}, {pipeline_mode = #tpu.pipeline_mode<synchronous>, transform_indices = @transform_1, window_bounds = array<i64: 32, 64>}, {pipeline_mode = #tpu.pipeline_mode<synchronous>, transform_indices = @transform_2, window_bounds = array<i64: 1, 64>}, {pipeline_mode = #tpu.pipeline_mode<synchronous>, transform_indices = @transform_3, window_bounds = array<i64: 1, 64>}, {transform_indices = @transform_4, window_bounds = array<i64: 1, 1>}, {transform_indices = @transform_5, window_bounds = array<i64: 1, 8>}]} {
    %c0 = arith.constant 0 : index
    %c0_0 = arith.constant 0 : index
    %0 = vector.load %arg1[%c0, %c0_0] : memref<8x32xf32, #tpu.memory_space<vmem>>, vector<8x32xf32>
    %1 = arith.truncf %0 : vector<8x32xf32> to vector<8x32xbf16>
    %c0_1 = arith.constant 0 : index
    %c0_2 = arith.constant 0 : index
    %2 = vector.load %arg2[%c0_1, %c0_2] : memref<32x64xbf16, #tpu.memory_space<vmem>>, vector<32x64xbf16>
    %cst = arith.constant dense<0.000000e+00> : vector<8x64xf32>
    %3 = tpu.matmul %1, %2, %cst {dimension_numbers = #tpu.dot_dimension_numbers<[1], [0], [0], [1], [0, 0, 1, 1], [], []>} : vector<8x32xbf16>, vector<32x64xbf16>, vector<8x64xf32> -> vector<8x64xf32>
    %c0_3 = arith.constant 0 : index
    %c0_4 = arith.constant 0 : index
    %4 = vector.load %arg3[%c0_3, %c0_4] : memref<1x64xf32, #tpu.memory_space<vmem>>, vector<1x64xf32>
    %5 = vector.broadcast %4 : vector<1x64xf32> to vector<8x64xf32>
    %6 = arith.addf %3, %5 : vector<8x64xf32>
    %cst_5 = arith.constant 0.000000e+00 : f32
    %7 = vector.broadcast %cst_5 : f32 to vector<8x64xf32>
    %8 = arith.maximumf %6, %7 : vector<8x64xf32>
    %c0_6 = arith.constant 0 : index
    %c0_7 = arith.constant 0 : index
    %9 = vector.load %arg4[%c0_6, %c0_7] : memref<1x64xf32, #tpu.memory_space<vmem>>, vector<1x64xf32>
    %10 = vector.broadcast %9 : vector<1x64xf32> to vector<8x64xf32>
    %11 = arith.mulf %8, %10 : vector<8x64xf32>
    %cst_8 = arith.constant dense<0.000000e+00> : vector<8xf32>
    %12 = vector.multi_reduction <add>, %11, %cst_8 [1] : vector<8x64xf32> to vector<8xf32>
    %c0_9 = arith.constant 0 : index
    %c0_10 = arith.constant 0 : index
    %13 = memref.load %arg5[%c0_9, %c0_10] : memref<1x1xf32, #tpu.memory_space<smem>>
    %14 = vector.broadcast %13 : f32 to vector<8xf32>
    %15 = arith.addf %12, %14 : vector<8xf32>
    %16 = vector.shape_cast %15 : vector<8xf32> to vector<1x8xf32>
    %c0_11 = arith.constant 0 : index
    %c0_12 = arith.constant 0 : index
    %17 = vector.load %arg6[%c0_11, %c0_12] : memref<1x8xf32, #tpu.memory_space<vmem>>, vector<1x8xf32>
    tpu.vector_store %arg6[%c0_11, %c0_12], %16 {strides = array<i32>} : memref<1x8xf32, #tpu.memory_space<vmem>>, vector<1x8xf32>,
    return
  }
  func.func @transform_0(%arg0: i32) -> (i32, i32) {
    %c0_i32 = arith.constant 0 : i32
    %c0_i32_0 = arith.constant 0 : i32
    return %arg0, %c0_i32 : i32, i32
  }
  func.func @transform_1(%arg0: i32) -> (i32, i32) {
    %c0_i32 = arith.constant 0 : i32
    %c0_i32_0 = arith.constant 0 : i32
    %c0_i32_1 = arith.constant 0 : i32
    return %c0_i32, %c0_i32_0 : i32, i32
  }
  func.func @transform_2(%arg0: i32) -> (i32, i32) {
    %c0_i32 = arith.constant 0 : i32
    %c0_i32_0 = arith.constant 0 : i32
    %c0_i32_1 = arith.constant 0 : i32
    return %c0_i32, %c0_i32_0 : i32, i32
  }
  func.func @transform_3(%arg0: i32) -> (i32, i32) {
    %c0_i32 = arith.constant 0 : i32
    %c0_i32_0 = arith.constant 0 : i32
    %c0_i32_1 = arith.constant 0 : i32
    return %c0_i32, %c0_i32_0 : i32, i32
  }
  func.func @transform_4(%arg0: i32) -> (i32, i32) {
    %c0_i32 = arith.constant 0 : i32
    %c0_i32_0 = arith.constant 0 : i32
    %c0_i32_1 = arith.constant 0 : i32
    return %c0_i32, %c0_i32_0 : i32, i32
  }
  func.func @transform_5(%arg0: i32) -> (i32, i32) {
    %c0_i32 = arith.constant 0 : i32
    %c0_i32_0 = arith.constant 0 : i32
    return %arg0, %c0_i32 : i32, i32
  }
}

</mosaic_0001>

<bundles_post_ra>
// kernel: neural_network_forward.1
= control target key start
LH: loop header
LB: loop body
LE: loop exit
PB: predicated region body
PF: predicated region fallthrough
CT: control target
= control target key end

     0   :  { %v177_v1 = vmov 0.0   ;;  %vm178_vm0 = vmmov 0   ;;  %s240_s0 = inlined_call_operand.vmem [shape: f32[8,32], index: 0, kind: input, shape index: {}]   ;;  %s241_s1 = inlined_call_operand.vmem [shape: bf16[32,64], index: 1, kind: input, shape index: {}]   ;;  %s242_s2 = inlined_call_operand.vmem [shape: f32[1,64], index: 2, kind: input, shape index: {}]   ;;  %s243_s3 = inlined_call_operand.vmem [shape: f32[1,64], index: 3, kind: input, shape index: {}]   ;;  %s244_s4 = inlined_call_operand.<no memory space> [shape: f32[1,1], index: 4, kind: input, shape index: {}]   ;;  %s245_s5 = inlined_call_operand.hbm [shape: f32[1,8], index: 5, kind: output, shape index: {}]  }
   0x1   :  { %v151_v0 = vld [vmem:[%s241_s1] sm:$0xff]   ;;  %140 = vmatprep.subr.bf16.mxu0 %v177_v1  ;;  %v152_v2 = vld [vmem:[%s241_s1 + $0x8] sm:$0xff]   ;;  %144 = vmatprep.mubr.msk.bf16.mxu0 %vm178_vm0, %v177_v1 }
   0x2   :  { %141 = vmatpush3.bf16.msra.mxu0 %v151_v0  ;;  %v23_v3 = vld [vmem:[%s240_s0] sm:$0xff] }
   0x3   :  { %11 = vsyncpa [#allocation4], 0  ;;  %142 = vmatprep.subr.bf16.mxu0 %v177_v1  ;;  %v24_v4 = vpack.c.bf16 %v23_v3, %v23_v3  ;;  %vm48_vm1 = vcmask 261120   ;;  %v132_v5 = vld [vmem:[%s242_s2] ss:$0 sm:$0xff]  ;;  %vm101_vm2 = vcmask 523264   ;;  %v109_v15 = vlaneseq }
   0x4   :  { %v136_v10 = vld [vmem:[%s243_s3] ss:$0 sm:$0xff]  ;;  %v106_v18 = vstv %s244_s4  ;;  %s179_s2 = smov [#allocation3]   ;;  %vm116_vm3 = vcmask 57344  }
   0x5   :  { %v110_v16 = vand.u32 127, %v109_v15  ;;  %v112_v17 = vshrl.u32 %v109_v15, 7  ;;  %s124_s28 = sshll.u32 %s179_s2, 4  ;;  %s125_s28 = int_to_ptr.vmem [resolvable:$true] %s124_s28 }
   0x6   :  { %143 = vmatpush3.bf16.msra.mxu0 %v152_v2  ;;  %s153_s3 = scalar_lea.vmem %s125_s28, 16  ;;  %s157_s29 = scalar_lea.vmem %s125_s28, 32 }
   0x7   :  { %v113_v19 = vsub.s32 %v110_v16, %v112_v17  ;;  %p154_p0 = scmp.ne.s32.totalorder %s125_s28, %s153_s3  ;;  %p158_p1 = scmp.lt.s32.totalorder %s125_s28, %s125_s28 }
   0x8   :  { %p159_p2 = scmp.lt.s32.totalorder %s157_s29, %s153_s3 }
   0x9   :  { %145 = vmatmul.mubr.msk.bf16.vlgmr.msra.gmra.mrb[0].mxu0 %vm48_vm1, %v24_v4 }
   0xa   :  { %p160_p3 = por %p159_p2, %p158_p1 }
   0xc   :  { %p161_p4 = pnand %p160_p3, %p154_p0 }
  0xdc   :  { %v86_v6 = vpop.f32.mrb[0].mxu0 }
  0xdd   :  { %v87_v7 = vadd.f32 %v132_v5, %v86_v6  ;;  %v146_v8 = vpop.f32.mrb[1].mxu0 }
  0xde   :  { %v89_v9 = vpop.f32.mrb[2].mxu0 }
  0xdf   :  { %v92_v11 = vmax.f32 %v87_v7, 0.0  ;;  %v147_v12 = vpop.f32.mrb[3].mxu0 }
  0xe1   :  { %v100_v13 = vmul.f32 %v136_v10, %v92_v11 }
  0xe3   :  { %v102_v14 = vsel %vm101_vm2, %v100_v13, 0.0 }
  0xe4   :  { %103 = vadd.xlane.f32.xlu0 %v102_v14 }
 0x171   :  { %v104_v20 = vpop.xlane.xlu0 %103 }
 0x172   :  { %v107_v21 = vadd.f32 %v106_v18, %v104_v20 }
 0x174   :  { %v114_v22 = vrot.slane %v107_v21, %v113_v19 }
 0x176   :  { %117 = vst.msk [vmem:[#allocation3] sm:$0x1] %vm116_vm3, %v114_v22 }
 0x177   :  { %164 = shalt.err (!%p161_p4)
}
 0x178   :  { %s165_s4 = scalar_lea.hbm %s245_s5, 16 }
 0x179   :  { %p166_p5 = scmp.ne.s32.totalorder %s245_s5, %s165_s4  ;;  %p169_p6 = scmp.lt.u32.totalorder %s165_s4, %s245_s5 }
 0x17b   :  { %p171_p7 = pnand %p169_p6, %p166_p5 }
 0x17d   :  { %174 = shalt.err (!%p171_p7)
}
 0x17e   :  { %127 = dma.vmem_to_hbm [thread:$0]  %s125_s28, 16, %s245_s5, [#allocation4]  }
 0x17f   :  { %175 = dma.done.wait [#allocation4], 16  }
 0x180   :  { %176 = vsyncadd [#allocation4], 4294967280 }
 0x181   :  { %131 = vsyncpa [#allocation4], 1 }

</bundles_post_ra>
